<compile_context>
chip_gen: v6e
topology: v6e:2x2x1
jax: 0.10.0
libtpu: 0.0.40
codegen_flags: <defaults>
</compile_context>

<pallas_src>
import functools
import math

import jax
import jax.numpy as jnp
from jax.experimental import pallas as pl
from jax.experimental.pallas import tpu as pltpu


# ------------------------------ kernels ------------------------------

def patch_embed_kernel(p_ref, w_ref, b_ref, o_ref):
    """Conv2d(C, D, kernel=16, stride=16) as a matmul over flattened patches."""
    p = p_ref[...].astype(jnp.bfloat16)                                # (n_patches, patch_dim)
    y = jnp.dot(p, w_ref[...], preferred_element_type=jnp.float32) + b_ref[...]
    o_ref[...] = y.astype(o_ref.dtype)


def _layer_norm(x, gamma, beta, eps=1e-5):
    # f32 statistics (PyTorch nn.LayerNorm default eps=1e-5).
    mean = jnp.mean(x, axis=-1, keepdims=True)
    var = jnp.mean(jnp.square(x - mean), axis=-1, keepdims=True)
    return (x - mean) * jax.lax.rsqrt(var + eps) * gamma + beta


def encoder_stack_kernel(x_ref,
                         ln1_g, ln1_b,
                         wq, bq, wk, bk, wv, bv, wo, bo,
                         ln2_g, ln2_b,
                         wfc1, bfc1, wfc2, bfc2,
                         o_ref, act_ref, *, num_heads, n_true):
    """All encoder layers fused: grid = (depth, batch); activations live in VMEM scratch."""
    l = pl.program_id(0)                      # layer index (weights indexed by l only)
    b = pl.program_id(1)                      # batch element

    # Load the embedded sequence into the resident activation buffer on layer 0.
    @pl.when(l == 0)
    def _():
        act_ref[b] = x_ref[...]

    x = act_ref[b]                            # (N_pad, D) f32 resident activations
    N, D = x.shape
    H = num_heads
    Dh = D // H
    scale = 1.0 / math.sqrt(Dh)

    # ---- Multi-head self-attention (pre-norm) ----
    h = _layer_norm(x, ln1_g[...], ln1_b[...])
    hb = h.astype(jnp.bfloat16)               # bf16 operands, f32 accumulation on the MXU
    q = jnp.dot(hb, wq[...], preferred_element_type=jnp.float32) + bq[...]
    k = jnp.dot(hb, wk[...], preferred_element_type=jnp.float32) + bk[...]
    v = jnp.dot(hb, wv[...], preferred_element_type=jnp.float32) + bv[...]
    q = q * scale                             # fold 1/sqrt(Dh) into q (cheaper than scaling scores)

    def split_heads(t):                       # (N, D) f32 -> (H, N, Dh) bf16, heads leading
        return jnp.stack([t[:, i * Dh:(i + 1) * Dh] for i in range(H)],
                         axis=0).astype(jnp.bfloat16)

    qh, kh, vh = split_heads(q), split_heads(k), split_heads(v)

    # Single head-batched score matmul + softmax (f32) + weighted sum.
    s = jnp.einsum("hnd,hmd->hnm", qh, kh, preferred_element_type=jnp.float32)
    if n_true < N:                            # mask padded key positions (static condition)
        key_ids = jax.lax.broadcasted_iota(jnp.int32, (1, 1, N), 2)
        s = jnp.where(key_ids >= n_true, -1e30, s)
    s = s - jnp.max(s, axis=-1, keepdims=True)
    p = jnp.exp(s)
    p = p * pl.reciprocal(jnp.sum(p, axis=-1, keepdims=True), approx=True)
    a = jnp.einsum("hnm,hmd->hnd", p.astype(jnp.bfloat16), vh,
                   preferred_element_type=jnp.float32)
    attn = jnp.concatenate([a[i] for i in range(H)], axis=-1)          # (N, D) f32

    x = x + jnp.dot(attn.astype(jnp.bfloat16), wo[...],
                    preferred_element_type=jnp.float32) + bo[...]      # f32 residual

    # ---- MLP (pre-norm) ----
    m = _layer_norm(x, ln2_g[...], ln2_b[...]).astype(jnp.bfloat16)
    m = jnp.dot(m, wfc1[...], preferred_element_type=jnp.float32) + bfc1[...]
    # TODO(synk): tanh-approx GELU; PyTorch nn.GELU / TransformerEncoder default is erf-exact.
    m = jax.nn.gelu(m, approximate=True)
    m = jnp.dot(m.astype(jnp.bfloat16), wfc2[...],
                preferred_element_type=jnp.float32) + bfc2[...]
    x = x + m

    act_ref[b] = x                            # carry to next layer (stays in VMEM)
    o_ref[...] = x.astype(o_ref.dtype)        # last-layer writeback lands last -> correct output


# ------------------------------ forward wrapper ------------------------------

def base_vit_forward(x_img, params, *, patch=16, num_heads=4):
    B, C, H, W = x_img.shape
    gh, gw = H // patch, W // patch
    n_patches = gh * gw
    patch_dim = C * patch * patch

    # glue: NCHW image -> flattened patches in (c, ph, pw) element order
    # (matches nn.Conv2d(C, D, 16, 16).weight.reshape(D, -1)).
    patches = (x_img.reshape(B, C, gh, patch, gw, patch)
               .transpose(0, 2, 4, 1, 3, 5)
               .reshape(B, n_patches, patch_dim))

    pw, pb = params["patch_w"], params["patch_b"]
    D = pw.shape[1]
    assert D % num_heads == 0

    tokens = pl.pallas_call(
        patch_embed_kernel,
        out_shape=jax.ShapeDtypeStruct((B, n_patches, D), jnp.float32),
        grid=(B,),
        in_specs=[pl.BlockSpec((None, n_patches, patch_dim), lambda b: (b, 0, 0)),
                  pl.BlockSpec((patch_dim, D), lambda b: (0, 0)),
                  pl.BlockSpec((1, D), lambda b: (0, 0))],
        out_specs=pl.BlockSpec((None, n_patches, D), lambda b: (b, 0, 0)),
        compiler_params=pltpu.CompilerParams(dimension_semantics=("parallel",)),
    )(patches, pw, pb)

    # glue: prepend cls token, add positional embedding, pad tokens to a multiple of 8.
    cls = jnp.broadcast_to(params["cls"], (B, 1, D))
    seq = jnp.concatenate([cls, tokens], axis=1) + params["pos"]
    n_true = seq.shape[1]
    n_pad = ((n_true + 7) // 8) * 8
    if n_pad != n_true:
        seq = jnp.pad(seq, ((0, 0), (0, n_pad - n_true), (0, 0)))

    stacked = params["stacked"]
    depth = stacked["wq"].shape[0]
    weight_order = ["ln1_g", "ln1_b", "wq", "bq", "wk", "bk", "wv", "bv",
                    "wo", "bo", "ln2_g", "ln2_b", "wfc1", "bfc1", "wfc2", "bfc2"]
    weights = [stacked[k] for k in weight_order]

    def wspec(shape):
        # Indexed by the layer axis only: fetched once per layer, reused across the
        # inner batch loop, and prefetched for layer l+1 during layer l compute.
        nd = len(shape)
        return pl.BlockSpec((None,) + tuple(shape[1:]),
                            lambda l, b, _nd=nd: (l,) + (0,) * (_nd - 1))

    kern = functools.partial(encoder_stack_kernel, num_heads=num_heads, n_true=n_true)
    out = pl.pallas_call(
        kern,
        out_shape=jax.ShapeDtypeStruct((B, n_pad, D), jnp.float32),
        grid=(depth, B),                       # depth outer, batch inner
        in_specs=[pl.BlockSpec((None, n_pad, D), lambda l, b: (b, 0, 0))]
                 + [wspec(w.shape) for w in weights],
        out_specs=pl.BlockSpec((None, n_pad, D), lambda l, b: (b, 0, 0)),
        scratch_shapes=[pltpu.VMEM((B, n_pad, D), jnp.float32)],       # resident activations
        compiler_params=pltpu.CompilerParams(
            dimension_semantics=("arbitrary", "arbitrary"),
            vmem_limit_bytes=48 * 1024 * 1024),
    )(seq, *weights)

    return out[:, :n_true, :]                  # drop the padded tokens


# ------------------------------ deterministic params ------------------------------

def init_params(key, *, C, patch, D, depth, n_patches, mlp_ratio=4):
    patch_dim = C * patch * patch
    Dm = mlp_ratio * D
    keys = jax.random.split(key, 3 + depth)

    def nrm(k, shape, scale=0.02, dtype=jnp.bfloat16):
        return (scale * jax.random.normal(k, shape, dtype=jnp.float32)).astype(dtype)

    params = {
        "patch_w": nrm(keys[0], (patch_dim, D)),                       # bf16 matmul weight
        "patch_b": jnp.zeros((1, D), jnp.float32),
        "cls": nrm(keys[1], (1, 1, D), dtype=jnp.float32),
        "pos": nrm(keys[2], (1, 1 + n_patches, D), dtype=jnp.float32),
    }

    wq, wk, wv, wo, wfc1, wfc2 = [], [], [], [], [], []
    for li in range(depth):
        lk = jax.random.split(keys[3 + li], 6)
        wq.append(nrm(lk[0], (D, D)))
        wk.append(nrm(lk[1], (D, D)))
        wv.append(nrm(lk[2], (D, D)))
        wo.append(nrm(lk[3], (D, D)))
        wfc1.append(nrm(lk[4], (D, Dm)))
        wfc2.append(nrm(lk[5], (Dm, D)))

    zeros = lambda c: jnp.zeros((depth, 1, c), jnp.float32)
    params["stacked"] = {
        "ln1_g": jnp.ones((depth, 1, D), jnp.float32), "ln1_b": zeros(D),
        "wq": jnp.stack(wq), "bq": zeros(D),
        "wk": jnp.stack(wk), "bk": zeros(D),
        "wv": jnp.stack(wv), "bv": zeros(D),
        "wo": jnp.stack(wo), "bo": zeros(D),
        "ln2_g": jnp.ones((depth, 1, D), jnp.float32), "ln2_b": zeros(D),
        "wfc1": jnp.stack(wfc1), "bfc1": zeros(Dm),
        "wfc2": jnp.stack(wfc2), "bfc2": zeros(D),
    }
    return params


if __name__ == "__main__":
    # Small shapes consistent with the module: patch 16, embed dim a multiple of 128
    # (ViT-Base uses 768), n_patches = (H//16)*(W//16).
    B, C, H, W = 2, 3, 32, 32
    patch, D, depth, heads = 16, 128, 2, 4
    n_patches = (H // patch) * (W // patch)

    key = jax.random.PRNGKey(0)
    kx, kp = jax.random.split(key)
    x = jax.random.normal(kx, (B, C, H, W), dtype=jnp.float32)
    params = init_params(kp, C=C, patch=patch, D=D, depth=depth, n_patches=n_patches)

    out = base_vit_forward(x, params, patch=patch, num_heads=heads)
    jax.block_until_ready(out)
    assert out.shape == (B, 1 + n_patches, D), out.shape
    print("KERNEL_OK")
</pallas_src>

<mosaic_0001>
module attributes {stable_mosaic.version = 11 : i64} {
  func.func @patch_embed_kernel(%arg0: i32, %arg1: memref<1x4x768xf32, #tpu.memory_space<vmem>>, %arg2: memref<768x128xbf16, #tpu.memory_space<vmem>>, %arg3: memref<1x128xf32, #tpu.memory_space<vmem>>, %arg4: memref<1x4x128xf32, #tpu.memory_space<vmem>>) attributes {dimension_semantics = [#tpu.dimension_semantics<parallel>], iteration_bounds = array<i64: 2>, scalar_prefetch = 0 : i64, scratch_operands = 0 : i64, tpu.core_type = #tpu.core_type<tc>, window_params = [{transform_indices = @transform_0, window_bounds = array<i64: 1, 4, 768>}, {pipeline_mode = #tpu.pipeline_mode<synchronous>, transform_indices = @transform_1, window_bounds = array<i64: 768, 128>}, {pipeline_mode = #tpu.pipeline_mode<synchronous>, transform_indices = @transform_2, window_bounds = array<i64: 1, 128>}, {transform_indices = @transform_3, window_bounds = array<i64: 1, 4, 128>}]} {
    %c0 = arith.constant 0 : index
    %c0_0 = arith.constant 0 : index
    %c0_1 = arith.constant 0 : index
    %0 = vector.load %arg1[%c0, %c0_0, %c0_1] : memref<1x4x768xf32, #tpu.memory_space<vmem>>, vector<1x4x768xf32>
    %1 = vector.shape_cast %0 : vector<1x4x768xf32> to vector<4x768xf32>
    %2 = arith.truncf %1 : vector<4x768xf32> to vector<4x768xbf16>
    %c0_2 = arith.constant 0 : index
    %c0_3 = arith.constant 0 : index
    %3 = vector.load %arg2[%c0_2, %c0_3] : memref<768x128xbf16, #tpu.memory_space<vmem>>, vector<768x128xbf16>
    %cst = arith.constant dense<0.000000e+00> : vector<4x128xf32>
    %4 = tpu.matmul %2, %3, %cst {dimension_numbers = #tpu.dot_dimension_numbers<[1], [0], [0], [1], [0, 0, 1, 1], [], []>} : vector<4x768xbf16>, vector<768x128xbf16>, vector<4x128xf32> -> vector<4x128xf32>
    %c0_4 = arith.constant 0 : index
    %c0_5 = arith.constant 0 : index
    %5 = vector.load %arg3[%c0_4, %c0_5] : memref<1x128xf32, #tpu.memory_space<vmem>>, vector<1x128xf32>
    %6 = vector.broadcast %5 : vector<1x128xf32> to vector<4x128xf32>
    %7 = arith.addf %4, %6 : vector<4x128xf32>
    %c0_6 = arith.constant 0 : index
    %c0_7 = arith.constant 0 : index
    %c0_8 = arith.constant 0 : index
    %8 = vector.load %arg4[%c0_6, %c0_7, %c0_8] : memref<1x4x128xf32, #tpu.memory_space<vmem>>, vector<1x4x128xf32>
    %9 = vector.shape_cast %8 : vector<1x4x128xf32> to vector<4x128xf32>
    %10 = vector.shape_cast %7 : vector<4x128xf32> to vector<1x4x128xf32>
    tpu.vector_store %arg4[%c0_6, %c0_7, %c0_8], %10 {strides = array<i32>} : memref<1x4x128xf32, #tpu.memory_space<vmem>>, vector<1x4x128xf32>,
    return
  }
  func.func @transform_0(%arg0: i32) -> (i32, i32, i32) {
    %c0_i32 = arith.constant 0 : i32
    %c0_i32_0 = arith.constant 0 : i32
    %c0_i32_1 = arith.constant 0 : i32
    return %arg0, %c0_i32, %c0_i32_0 : i32, i32, i32
  }
  func.func @transform_1(%arg0: i32) -> (i32, i32) {
    %c0_i32 = arith.constant 0 : i32
    %c0_i32_0 = arith.constant 0 : i32
    %c0_i32_1 = arith.constant 0 : i32
    return %c0_i32, %c0_i32_0 : i32, i32
  }
  func.func @transform_2(%arg0: i32) -> (i32, i32) {
    %c0_i32 = arith.constant 0 : i32
    %c0_i32_0 = arith.constant 0 : i32
    %c0_i32_1 = arith.constant 0 : i32
    return %c0_i32, %c0_i32_0 : i32, i32
  }
  func.func @transform_3(%arg0: i32) -> (i32, i32, i32) {
    %c0_i32 = arith.constant 0 : i32
    %c0_i32_0 = arith.constant 0 : i32
    %c0_i32_1 = arith.constant 0 : i32
    return %arg0, %c0_i32, %c0_i32_0 : i32, i32, i32
  }
}

</mosaic_0001>

<bundles_post_ra>
// kernel: tpu_custom_call.1
= control target key start
LH: loop header
LB: loop body
LE: loop exit
PB: predicated region body
PF: predicated region fallthrough
CT: control target
= control target key end

     0   :  { %8 = vsyncpa [#allocation3], 0  ;;  %s1385_s0 = inlined_call_operand.hbm [shape: f32[2,4,768], index: 0, kind: input, shape index: {}]   ;;  %s1386_s1 = inlined_call_operand.hbm [shape: bf16[768,128], index: 1, kind: input, shape index: {}]   ;;  %s1387_s2 = inlined_call_operand.vmem [shape: f32[1,128], index: 2, kind: input, shape index: {}]   ;;  %s1388_s3 = inlined_call_operand.hbm [shape: f32[2,4,128], index: 3, kind: output, shape index: {}]  }
   0x1   :  { %10 = vsyncpa [#allocation3 + $0x1], 0 }
   0x2   :  { %11 = vsyncpa [#allocation6], 0 }
   0x3   :  { %12 = vsyncpa [#allocation4], 0 }
   0x4   :  { %14 = vsyncpa [#allocation4 + $0x1], 0  ;;  %s1216_s12 = smov 0   ;;  %s1218_s13 = smov 0  }
   0x5   :  { %s1220_s14 = smov 0   ;;  %s1222_s15 = smov 0  }
   0x6 LB: > { %s1237_s16 = sadd.s32 4294967295, %s1189_s15   ;;  %s827_s17 = sadd.s32 4294967294, %s1189_s15   ;;  %s1189_s15 = sphi %s1222_s15, %s1410_s15   ;;  %s1185_s14 = sphi %s1220_s14, %s1409_s14   ;;  %s1181_s13 = sphi %s1218_s13, %s1408_s13   ;;  %s1177_s12 = sphi %s1216_s12, %s1407_s12  }
   0x7   : > { %p40_p0 = scmp.ne.s32.totalorder %s1181_s13, %s1177_s12  ;;  %p1389_p1 = scmp.eq.s32.totalorder %s1237_s16, 0 }
   0x8   : > { %p112_p3 = scmp.eq.s32.totalorder %s827_s17, 1  ;;  %p828_p5 = scmp.ge.s32.totalorder %s1189_s15, 1 }
   0x9   : > { %p1246_p4 = por %p1389_p1, %p40_p0  ;;  %p119_p7 = scmp.lt.s32.totalorder %s1189_s15, 3 }
   0xa   : > { %p1251_p6 = por %p112_p3, %p40_p0  ;;  %s1191_s21 = smov [#allocation5]  }
   0xb   : > { %s1393_s18 = scalar_select %p1246_p4, 1, 0 }
   0xc   : > { %s1394_s19 = scalar_select %p1251_p6, 1, 0 }
   0xd   : > { %p1256_p8 = pnand %p828_p5, %p119_p7  ;;  %s131_s22 = sshll.u32 %s1191_s21, 4  ;;  %s132_s22 = int_to_ptr.vmem [resolvable:$true] %s131_s22 }
   0xe   : > { %s1270_s24 = sadd.s32 1, %s1189_s15   ;;  %s27_s25 = sadd.s32 1, %s1185_s14 }
   0xf   : > { %s1395_s20 = scalar_select %p1256_p8, 1, 0 }
  0x10   : > { %p965_p9 = pneg %p1256_p8  ;;  %s24_s26 = ssub.s32 %s1189_s15, %s1270_s24 }
  0x11   : > { %s1078_s27 = scalar_lea.vmem %s132_s22, 6144  ;;  %p1086_p5 = scmp.lt.s32.totalorder %s132_s22, %s132_s22 }
  0x12   : > { %p1265_p11 = pnand %p965_p9, %p1389_p1  ;;  %p1079_p13 = scmp.ne.s32.totalorder %s132_s22, %s1078_s27 }
  0x13   : > { %p1087_p7 = scmp.lt.s32.totalorder %s1078_s27, %s1078_s27 }
  0x14   : > { %p1069_p12 = pneg %p1265_p11 }
  0x15   : > { %p1088_p10 = por %p1087_p7, %p1086_p5 }
  0x16   : > { %p1081_p0 = pnand %p1079_p13, %p1069_p12 }
  0x18   : > { %p1082_p3 = pneg %p1081_p0 }
  0x1a   : > { %p1089_p2 = pnand %p1088_p10, %p1082_p3 }
  0x1c   : > { %1092 = shalt.err (!%p1089_p2)
}
  0x1d   : > { %s1192_s28 = smov 64   ;;  %s1193_s29 = smov 4  }
  0x1e   : > { %968 = dma.hbm_to_vmem [thread:$0]  (!%p1265_p11), %s1386_s1, 6144, %s132_s22, [#allocation6], %s1192_s28, %s1192_s28, %s1193_s29  }
  0x1f   : > { %p25_p9 = scmp.eq.s32.totalorder %s24_s26, 0  ;;  %p34_p12 = scmp.ne.s32.totalorder %s1185_s14, %s1181_s13 }
  0x20   : > { %p35_p10 = scmp.eq.s32.totalorder %s1189_s15, 0  ;;  %p978_p2 = scmp.lt.s32.totalorder %s1189_s15, 2 }
  0x21   : > { %s1287_s5 = scalar_select %p25_p9, %s1185_s14, %s27_s25  }
  0x22   : > { %p36_p13 = por %p35_p10, %p34_p12  ;;  %p1397_p0 = scmp.eq.s32.totalorder %s1237_s16, 1 }
  0x23   : > { %s148_s7 = sand.u32 1, %s1185_s14   ;;  %s955_s8 = smul.u32 384, %s1189_s15 }
  0x24   : > { %p1291_p3 = por %p1397_p0, %p34_p12  ;;  %s954_s9 = smul.u32 24, %s148_s7 }
  0x25   : > { %p1297_p5 = pnand %p978_p2, %p36_p13  ;;  %s1304_s21 = scalar_lea.hbm %s1385_s0, %s955_s8 }
  0x26   : > { %s1398_s6 = scalar_select %p1291_p3, 1, 0 }
  0x27   : > { %s152_s22 = scalar_lea.vmem [#allocation2], %s954_s9  ;;  %s149_s25 = scalar_lea.sflag [#allocation3], %s148_s7 }
  0x28   : > { %s160_s23 = sshll.u32 %s152_s22, 4  ;;  %s1093_s26 = scalar_lea.hbm %s1304_s21, 384  ;;  %s161_s23 = int_to_ptr.vmem [resolvable:$true] %s160_s23 }
  0x29   : > { %p1094_p11 = scmp.ne.s32.totalorder %s1304_s21, %s1093_s26  ;;  %p1095_p7 = pneg %p1297_p5 }
  0x2a   : > { %s1098_s29 = scalar_lea.hbm %s1385_s0, 768  ;;  %p1099_p10 = scmp.lt.s32.totalorder %s1304_s21, %s1385_s0 }
  0x2b   : > { %p1096_p9 = pnand %p1095_p7, %p1094_p11  ;;  %p1100_p2 = scmp.lt.s32.totalorder %s1098_s29, %s1093_s26 }
  0x2d   : > { %p1097_p12 = pneg %p1096_p9  ;;  %p1101_p13 = por %p1100_p2, %p1099_p10 }
  0x2f   : > { %p1102_p0 = pnand %p1101_p13, %p1097_p12 }
  0x31   : > { %1105 = shalt.err (!%p1102_p0)
}
  0x32   : > { %s1106_s8 = scalar_lea.vmem %s161_s23, 384  ;;  %s1194_s7 = smov [#allocation2]  }
  0x33   : > { %p1107_p1 = scmp.ne.s32.totalorder %s161_s23, %s1106_s8  ;;  %s1111_s9 = sshll.u32 %s1194_s7, 4  ;;  %s1112_s9 = int_to_ptr.vmem [resolvable:$false] %s1111_s9 }
  0x34   : > { %s1113_s11 = scalar_lea.vmem %s1112_s9, 768  ;;  %p1114_p11 = scmp.lt.s32.totalorder %s161_s23, %s1112_s9 }
  0x35   : > { %p1109_p6 = pnand %p1107_p1, %p1095_p7  ;;  %p1115_p9 = scmp.lt.s32.totalorder %s1113_s11, %s1106_s8 }
  0x37   : > { %p1110_p3 = pneg %p1109_p6  ;;  %p1116_p4 = por %p1115_p9, %p1114_p11 }
  0x39   : > { %p1117_p8 = pnand %p1116_p4, %p1110_p3 }
  0x3b   : > { %1120 = shalt.err (!%p1117_p8)
}
  0x3c   : > { %972 = dma.hbm_to_vmem [thread:$0]  (!%p1297_p5), %s1304_s21, 384, %s161_s23, %s149_s25  }
  0x3d   : > { %p1400_p12 = scmp.ne.s32.totalorder %s1395_s20, 0 }
  0x3e   : > { %s1323_s17 = sand.u32 (!%p1400_p12), 1, %s1181_s13   ;;  %p1401_p1 = scmp.ne.s32.totalorder (!%p1400_p12), %s1393_s18, 0 }
  0x3f   : > { %169 = sbr.rel (%p1400_p12) target bundleno = 349 (0x15d), region = 32  ;;  %s172_s26 = scalar_lea.sflag (!%p1400_p12), [#allocation3], %s1323_s17 }
  0x40   : > { %s956_s22 = smul.u32 (!%p1400_p12), 24, %s1323_s17 }
  0x42   : > { %s1327_s27 = scalar_lea.vmem (!%p1400_p12), [#allocation2], %s956_s22 }
  0x44   : > { %1164 = dma.done.wait (%p1401_p1), %s172_s26, 384  }
  0x45   : > { %1166 = vsyncadd (%p1401_p1), %s172_s26, 4294966912  ;;  %p1402_p4 = scmp.eq.s32.totalorder %s1237_s16, 0 }
  0x47   : > { %1168 = dma.done.wait (%p1402_p4), [#allocation6], 6144   ;;  %p1403_p6 = pmov %p1402_p4 }
  0x48   : > { %v1016_v0 = vld [vmem:[#allocation5 + $0x78] sm:$0xff]   ;;  %v1020_v4 = vld [vmem:[#allocation5 + $0x70] sm:$0xff]   ;;  %v1024_v8 = vld [vmem:[#allocation5 + $0x68] sm:$0xff]   ;;  %s834_s10 = sshll.u32 %s1323_s17, 2  ;;  %s885_s21 = sshll.u32 %s1237_s16, 6 }
  0x49   : > { %1170 = vsyncadd (%p1403_p6), [#allocation6], 4294961152  ;;  %v1017_v1 = vld [vmem:[#allocation5 + $0x38] sm:$0xff]   ;;  %888 = vmatprep.subr.bf16.mxu0 %v1016_v0  ;;  %v1021_v5 = vld [vmem:[#allocation5 + $0x30] sm:$0xff]   ;;  %s201_s23 = scalar_lea.vmem [#allocation7], %s834_s10  ;;  %s1348_s30 = scalar_lea.hbm %s1388_s3, %s885_s21 }
  0x4a   : > { %v1018_v2 = vld [vmem:[#allocation5 + $0xf8] sm:$0xff]   ;;  %889 = vmatpush3.bf16.msra.mxu0 %v1017_v1  ;;  %v1022_v6 = vld [vmem:[#allocation5 + $0xf0] sm:$0xff]   ;;  %v1025_v9 = vld [vmem:[#allocation5 + $0x28] sm:$0xff]   ;;  %s747_s25 = sshll.u32 %s201_s23, 4  ;;  %s734_s4 = scalar_lea.sflag [#allocation4], %s1323_s17  ;;  %s748_s25 = int_to_ptr.vmem [resolvable:$true] %s747_s25 }
  0x4b   : > { %v1019_v3 = vld [vmem:[#allocation5 + $0xb8] sm:$0xff]   ;;  %910 = vmatprep.subr.bf16.mxu1 %v1018_v2  ;;  %890 = vmatprep.subr.bf16.mxu0 %v1020_v4  ;;  %v1023_v7 = vld [vmem:[#allocation5 + $0xb0] sm:$0xff]   ;;  %v1026_v10 = vld [vmem:[#allocation5 + $0xe8] sm:$0xff]   ;;  %s1121_s8 = scalar_lea.vmem %s748_s25, 64  ;;  %p1404_p3 = scmp.ne.s32.totalorder %s1398_s6, 0 }
  0x4c   : > { %911 = vmatpush3.bf16.msra.mxu1 %v1019_v3  ;;  %v1027_v11 = vld [vmem:[#allocation5 + $0xa8] sm:$0xff]   ;;  %v1028_v12 = vld [vmem:[#allocation5 + $0x60] sm:$0xff]   ;;  %v1032_v16 = vld [vmem:[#allocation5 + $0x58] sm:$0xff]   ;;  %p1122_p8 = scmp.ne.s32.totalorder %s748_s25, %s1121_s8  ;;  %s1195_s16 = smov [#allocation7]  }
  0x4d   : > { %912 = vmatprep.subr.bf16.mxu1 %v1022_v6  ;;  %v1029_v13 = vld [vmem:[#allocation5 + $0x20] sm:$0xff]   ;;  %v1033_v17 = vld [vmem:[#allocation5 + $0x18] sm:$0xff]   ;;  %v1036_v20 = vld [vmem:[#allocation5 + $0x50] sm:$0xff]   ;;  %s1125_s7 = sshll.u32 %s1195_s16, 4  ;;  %s1126_s7 = int_to_ptr.vmem [resolvable:$false] %s1125_s7 }
  0x4e   : > { %891 = vmatpush3.bf16.msra.mxu0 %v1021_v5  ;;  %v1030_v14 = vld [vmem:[#allocation5 + $0xe0] sm:$0xff]   ;;  %v1034_v18 = vld [vmem:[#allocation5 + $0xd8] sm:$0xff]   ;;  %v1037_v21 = vld [vmem:[#allocation5 + $0x10] sm:$0xff]   ;;  %p1123_p5 = pnand %p1122_p8, %p1404_p3  ;;  %s1127_s9 = scalar_lea.vmem %s1126_s7, 128 }
  0x4f   : > { %892 = vmatprep.subr.bf16.mxu0 %v1024_v8  ;;  %v1031_v15 = vld [vmem:[#allocation5 + $0xa0] sm:$0xff]   ;;  %v1035_v19 = vld [vmem:[#allocation5 + $0x98] sm:$0xff]   ;;  %v1038_v22 = vld [vmem:[#allocation5 + $0xd0] sm:$0xff]   ;;  %p1128_p10 = scmp.lt.s32.totalorder %s748_s25, %s1126_s7  ;;  %p1129_p2 = scmp.lt.s32.totalorder %s1127_s9, %s1121_s8 }
  0x50   : > { %913 = vmatpush3.bf16.msra.mxu1 %v1023_v7  ;;  %v1039_v23 = vld [vmem:[#allocation5 + $0x90] sm:$0xff]   ;;  %v1040_v24 = vld [vmem:[#allocation5 + $0x48] sm:$0xff]   ;;  %v1044_v28 = vld [vmem:[#allocation5 + $0x40] sm:$0xff]   ;;  %p1124_p7 = pneg %p1123_p5 }
  0x51   : > { %914 = vmatprep.subr.bf16.mxu1 %v1026_v10  ;;  %v1041_v25 = vld [vmem:[#allocation5 + $0x8] sm:$0xff]   ;;  %v1045_v29 = vld [vmem:[#allocation5] sm:$0xff]   ;;  %v1049_v35 = vld [vmem:[#allocation5 + $0x178] sm:$0xff]   ;;  %p1130_p13 = por %p1129_p2, %p1128_p10 }
  0x52   : > { %893 = vmatpush3.bf16.msra.mxu0 %v1025_v9  ;;  %v1042_v26 = vld [vmem:[#allocation5 + $0xc8] sm:$0xff]   ;;  %v1046_v30 = vld [vmem:[#allocation5 + $0xc0] sm:$0xff]   ;;  %v204_v36 = vld [vmem:[%s1327_s27 + $0x8] sm:$0xff] }
  0x53   : > { %894 = vmatprep.subr.bf16.mxu0 %v1028_v12  ;;  %v1043_v27 = vld [vmem:[#allocation5 + $0x88] sm:$0xff]   ;;  %v1048_v33 = vld [vmem:[#allocation5 + $0x80] sm:$0xff]   ;;  %v210_v38 = vcombine.high %v204_v36, %v204_v36  ;;  %v1051_v39 = vld [vmem:[#allocation5 + $0x138] sm:$0xff]   ;;  %v217_v40 = vpack.c.bf16 %v204_v36, %v204_v36  ;;  %p1131_p0 = pnand %p1130_p13, %p1124_p7 }
  0x54   : > { %915 = vmatpush3.bf16.msra.mxu1 %v1027_v11  ;;  %v203_v31 = vld [vmem:[%s1327_s27] sm:$0xff]  ;;  %v1056_v46 = vld [vmem:[#allocation5 + $0x160] sm:$0xff]   ;;  %v1058_v48 = vld [vmem:[#allocation5 + $0x158] sm:$0xff]  }
  0x55   : > { %916 = vmatprep.subr.bf16.mxu1 %v1030_v14  ;;  %v209_v32 = vcombine.high %v203_v31, %v203_v31  ;;  %v215_v34 = vpack.c.bf16 %v203_v31, %v203_v31  ;;  %v1052_v41 = vld [vmem:[#allocation5 + $0x170] sm:$0xff]   ;;  %v218_v42 = vpack.c.bf16 %v210_v38, %v210_v38  ;;  %v1054_v44 = vld [vmem:[#allocation5 + $0x168] sm:$0xff]   ;;  %v1057_v47 = vld [vmem:[#allocation5 + $0x120] sm:$0xff]  }
  0x56   : > { %895 = vmatpush3.bf16.msra.mxu0 %v1029_v13  ;;  %v1053_v43 = vld [vmem:[#allocation5 + $0x130] sm:$0xff]   ;;  %v1055_v45 = vld [vmem:[#allocation5 + $0x128] sm:$0xff]   ;;  %v205_v49 = vld [vmem:[%s1327_s27 + $0x10] sm:$0xff] }
  0x57   : > { %896 = vmatprep.subr.bf16.mxu0 %v1032_v16  ;;  %v216_v37 = vpack.c.bf16 %v209_v32, %v209_v32  ;;  %684 = vmatprep.mubr.bf16.mxu1 %v218_v42  ;;  %v211_v50 = vcombine.high %v205_v49, %v205_v49  ;;  %v1059_v51 = vld [vmem:[#allocation5 + $0x118] sm:$0xff]   ;;  %v1060_v52 = vld [vmem:[#allocation5 + $0x150] sm:$0xff]   ;;  %v1062_v55 = vld [vmem:[#allocation5 + $0x148] sm:$0xff]   ;;  %v219_v59 = vpack.c.bf16 %v205_v49, %v205_v49 }
  0x58   : > { %917 = vmatpush3.bf16.msra.mxu1 %v1031_v15  ;;  %v1061_v54 = vld [vmem:[#allocation5 + $0x110] sm:$0xff]   ;;  %v1063_v56 = vld [vmem:[#allocation5 + $0x108] sm:$0xff]   ;;  %v1064_v57 = vld [vmem:[#allocation5 + $0x140] sm:$0xff]  }
  0x59   : > { %918 = vmatprep.subr.bf16.mxu1 %v1034_v18  ;;  %644 = vmatprep.mubr.bf16.mxu0 %v216_v37  ;;  %v220_v53 = vpack.c.bf16 %v211_v50, %v211_v50  ;;  %v1065_v58 = vld [vmem:[#allocation5 + $0x100] sm:$0xff]   ;;  %v835_v5 = vld [vmem:[%s1387_s2] ss:$0 sm:$0xff] }
  0x5a   : > { %897 = vmatpush3.bf16.msra.mxu0 %v1033_v17 }
  0x5b   : > { %898 = vmatprep.subr.bf16.mxu0 %v1036_v20 }
  0x5c   : > { %919 = vmatpush3.bf16.msra.mxu1 %v1035_v19 }
  0x5d   : > { %920 = vmatprep.subr.bf16.mxu1 %v1038_v22 }
  0x5e   : > { %899 = vmatpush3.bf16.msra.mxu0 %v1037_v21 }
  0x5f   : > { %900 = vmatprep.subr.bf16.mxu0 %v1040_v24 }
  0x60   : > { %921 = vmatpush3.bf16.msra.mxu1 %v1039_v23 }
  0x61   : > { %922 = vmatprep.subr.bf16.mxu1 %v1042_v26 }
  0x62   : > { %901 = vmatpush3.bf16.msra.mxu0 %v1041_v25 }
  0x63   : > { %902 = vmatprep.subr.bf16.mxu0 %v1044_v28 }
  0x64   : > { %923 = vmatpush3.bf16.msra.mxu1 %v1043_v27 }
  0x65   : > { %924 = vmatprep.subr.bf16.mxu1 %v1046_v30 }
  0x66   : > { %903 = vmatpush3.bf16.msra.mxu0 %v1045_v29 }
  0x67   : > { %932 = vmatprep.subr.bf16.mxu0 %v1049_v35 }
  0x68   : > { %925 = vmatpush3.bf16.msra.mxu1 %v1048_v33 }
  0x69   : > { %645 = vmatmul.mubr.bf16.vlgmr.msra.gmra.mxu0 %v215_v34 }
  0x6a   : > { %933 = vmatpush3.bf16.msra.mxu0 %v1051_v39  ;;  %724 = vmatprep.mubr.bf16.mxu0 %v220_v53 }
  0x6b   : > { %685 = vmatmul.mubr.bf16.vlgmr.msra.gmra.mxu1 %v217_v40  ;;  %934 = vmatprep.subr.bf16.mxu0 %v1052_v41 }
  0x6e   : > { %935 = vmatpush3.bf16.msra.mxu0 %v1053_v43 }
  0x6f   : > { %936 = vmatprep.subr.bf16.mxu0 %v1054_v44 }
  0x72   : > { %937 = vmatpush3.bf16.msra.mxu0 %v1055_v45 }
  0x73   : > { %938 = vmatprep.subr.bf16.mxu0 %v1056_v46 }
  0x76   : > { %939 = vmatpush3.bf16.msra.mxu0 %v1057_v47 }
  0x77   : > { %940 = vmatprep.subr.bf16.mxu0 %v1058_v48 }
  0x7a   : > { %941 = vmatpush3.bf16.msra.mxu0 %v1059_v51 }
  0x7b   : > { %942 = vmatprep.subr.bf16.mxu0 %v1060_v52 }
  0x7e   : > { %943 = vmatpush3.bf16.msra.mxu0 %v1061_v54 }
  0x7f   : > { %944 = vmatprep.subr.bf16.mxu0 %v1062_v55 }
  0x82   : > { %945 = vmatpush3.bf16.msra.mxu0 %v1063_v56 }
  0x83   : > { %946 = vmatprep.subr.bf16.mxu0 %v1064_v57 }
  0x86   : > { %947 = vmatpush3.bf16.msra.mxu0 %v1065_v58 }
  0x89   : > { %725 = vmatmul.mubr.bf16.vlgmr.msra.gmra.mxu0 %v219_v59 }
 0x129   : > { %v904_v60 = vpop.f32.mrf.mxu0 }
 0x12b   : > { %v905_v61 = vpop.f32.mrf.mxu0  ;;  %v926_v62 = vpop.f32.mrf.mxu1 }
 0x12c   : > { %v906_v4 = vadd.f32 %v905_v61, %v904_v60 }
 0x12d   : > { %v907_v63 = vpop.f32.mrf.mxu0  ;;  %v927_v0 = vpop.f32.mrf.mxu1 }
 0x12e   : > { %v647_v6 = vadd.f32 %v906_v4, %v835_v5  ;;  %v928_v7 = vadd.f32 %v927_v0, %v926_v62 }
 0x12f   : > { %v908_v1 = vpop.f32.mrf.mxu0  ;;  %v929_v2 = vpop.f32.mrf.mxu1 }
 0x130   : > { %v687_v10 = vadd.f32 %v928_v7, %v647_v6 }
 0x131   : > { %v930_v3 = vpop.f32.mrf.mxu1 }
 0x149   : > { %v948_v8 = vpop.f32.mrf.mxu0 }
 0x14b   : > { %v949_v9 = vpop.f32.mrf.mxu0 }
 0x14c   : > { %v950_v11 = vadd.f32 %v949_v9, %v948_v8 }
 0x14d   : > { %v951_v12 = vpop.f32.mrf.mxu0 }
 0x14e   : > { %v727_v13 = vadd.f32 %v950_v11, %v687_v10 }
 0x14f   : > { %v952_v14 = vpop.f32.mrf.mxu0 }
 0x150   : > { %732 = vst [vmem:[%s201_s23] sm:$0xf] %v727_v13 }
 0x151   : > { %1134 = shalt.err (!%p1131_p0)
}
 0x152   : > { %s1135_s11 = scalar_lea.hbm %s1348_s30, 64  ;;  %s1139_s26 = scalar_lea.hbm %s1388_s3, 128 }
 0x153   : > { %p1136_p11 = scmp.ne.s32.totalorder %s1348_s30, %s1135_s11  ;;  %p1140_p1 = scmp.lt.s32.totalorder %s1348_s30, %s1388_s3 }
 0x154   : > { %p1141_p4 = scmp.lt.s32.totalorder %s1139_s26, %s1135_s11 }
 0x155   : > { %p1137_p9 = pnand %p1136_p11, %p1404_p3 }
 0x156   : > { %p1142_p6 = por %p1141_p4, %p1140_p1 }
 0x157   : > { %p1138_p12 = pneg %p1137_p9 }
 0x159   : > { %p1143_p8 = pnand %p1142_p6, %p1138_p12 }
 0x15b   : > { %1146 = shalt.err (!%p1143_p8)
}
 0x15c   : > { %963 = dma.vmem_to_hbm [thread:$0]  (%p1404_p3), %s748_s25, 64, %s1348_s30, %s734_s4  }
 0x15d PF: > { %s759_s20 = sand.u32 1, %s1177_s12   ;;  %p1405_p5 = scmp.ne.s32.totalorder %s1394_s19, 0 }
 0x15e   : > { %p1406_p7 = scmp.ge.s32.totalorder %s1189_s15, 2  ;;  %s760_s10 = scalar_lea.sflag [#allocation4], %s759_s20 }
 0x160   : > { %p974_p10 = pnand %p1406_p7, %p1405_p5 }
 0x162   : > { %p975_p2 = pneg %p974_p10 }
 0x164   : > { %1172 = dma.done.wait (%p975_p2), %s760_s10, 64  }
 0x165   : > { %1174 = vsyncadd (%p975_p2), %s760_s10, 4294967232  ;;  %p17_p13 = scmp.ge.s32.totalorder %s1270_s24, 4   ;;  %s1407_s12 = smov %s1181_s13 }
 0x166   : > { %s1408_s13 = smov %s1185_s14  ;;  %s1409_s14 = smov %s1287_s5 }
 0x167   : > { %s1410_s15 = smov %s1270_s24  ;;  %19 = sbr.rel (!%p17_p13) target bundleno = 6 (0x6), region = 81 }
 0x16c   :  { %765 = vsyncpa [#allocation3], 1 }
 0x16d   :  { %767 = vsyncpa [#allocation3 + $0x1], 1 }
 0x16e   :  { %768 = vsyncpa [#allocation6], 1 }
 0x16f   :  { %769 = vsyncpa [#allocation4], 1 }
 0x170   :  { %771 = vsyncpa [#allocation4 + $0x1], 1 }

</bundles_post_ra>
